<compile_context>
chip_gen: v5e
topology: v5e:2x2
jax: 0.10.0
libtpu: 0.0.40
codegen_flags: <defaults>
</compile_context>

<pallas_src>
import jax
import jax.numpy as jnp
from jax.experimental import pallas as pl
from jax.experimental.pallas import tpu as pltpu


def _round_up(x, m):
    return (x + m - 1) // m * m


def temporal_block_kernel(xc_ref, wexp_ref, wshr_ref, bshr_ref, o_ref):
    """One (batch, time-tile) block per grid step.

    xc_ref:   (1, TT, K_pad)   bf16  im2col tile: fw taps fused on lanes + a 1.0
                                     bias column at lane K (BN shift folded in)
    wexp_ref: (K_pad, C_pad)   bf16  expand conv weight, BN scale folded in,
                                     row K = BN shift (bias row)
    wshr_ref: (C_pad, O_pad)   bf16  shrink 1x1 conv weight (transposed)
    bshr_ref: (1, O_pad)       f32   shrink bias
    o_ref:    (1, TT, O_pad)   f32   lane-dense (128-multiple) output tile
    """
    # Expand conv + BN (scale/shift folded into the weight): one MXU matmul.
    acc = jnp.dot(xc_ref[0], wexp_ref[...], preferred_element_type=jnp.float32)
    # ReLU in bf16 (cast is monotone, cast(0)=0) — cast needed for the shrink
    # matmul anyway; halves the VPU epilogue on v6e/v7x. Dropout = identity (eval).
    y = jnp.maximum(acc.astype(jnp.bfloat16), 0.0)
    # Shrink 1x1 conv: per-frame matmul on the MXU, f32 accumulation + bias.
    out = jnp.dot(y, wshr_ref[...], preferred_element_type=jnp.float32) + bshr_ref[...]
    o_ref[0] = out


def temporal_model_forward(x, params, tt=None):
    """x: (B, T, J_in, F) float32 -> (B, T_out, J_out, 3) float32."""
    B, T, J_in, F = x.shape
    C_in = J_in * F
    w_exp = params["w_exp"]           # (channels, C_in, fw)  -- PyTorch layout
    b_exp = params["b_exp"]           # (channels,)
    gamma, beta = params["gamma"], params["beta"]
    r_mean, r_var = params["r_mean"], params["r_var"]
    w_shr = params["w_shr"]           # (out_dim, channels, 1) -- PyTorch layout
    b_shr = params["b_shr"]           # (out_dim,)
    eps = 1e-5

    channels, _, fw = w_exp.shape
    out_dim = w_shr.shape[0]
    T_out = T - fw + 1

    # ---- time tile --------------------------------------------------------
    if tt is None:
        # Large tiles amortize the ~0.35 us/step pipeline overhead (v6e/v5e).
        tt = min(1024, _round_up(T_out, 8))
        if B == 1:
            # Ensure >= 2 grid steps so both v7x TensorCores get work.
            tt = min(tt, max(8, _round_up((T_out + 1) // 2, 8)))
    tt = max(8, _round_up(tt, 8))
    T_pad = _round_up(T_out, tt)

    # ---- fold + pad parameters (one-time wrapper cost) --------------------
    LANE = 128
    K = fw * C_in
    Kb = K + 1                          # +1 bias column (BN shift fused into matmul)
    K_pad = _round_up(Kb, LANE)
    C_pad = _round_up(channels, LANE)
    O_pad = _round_up(out_dim, LANE)

    bn_scale = gamma / jnp.sqrt(r_var + eps)                       # (channels,)
    bn_shift = (b_exp - r_mean) * bn_scale + beta                  # (channels,)

    # Fused expand weight: W[k*C_in + ci, co] = w_exp[co, ci, k] * bn_scale[co];
    # row K carries the BN shift (multiplied by the 1.0 bias column of x_col).
    w_fused = (jnp.transpose(w_exp, (2, 1, 0)).reshape(K, channels)
               * bn_scale[None, :]).astype(jnp.float32)
    wexp_p = jnp.zeros((K_pad, C_pad), jnp.float32)
    wexp_p = wexp_p.at[:K, :channels].set(w_fused)
    wexp_p = wexp_p.at[K, :channels].set(bn_shift)
    wexp_p = wexp_p.astype(jnp.bfloat16)

    wshr_p = jnp.zeros((C_pad, O_pad), jnp.float32)
    wshr_p = wshr_p.at[:channels, :out_dim].set(
        jnp.transpose(w_shr[:, :, 0], (1, 0)).astype(jnp.float32)).astype(jnp.bfloat16)

    bshr_p = jnp.zeros((1, O_pad), jnp.float32).at[:, :out_dim].set(b_shr)

    # ---- im2col directly in bf16 (valid conv -> single matmul) ------------
    x_flat = x.reshape(B, T, C_in).astype(jnp.bfloat16)            # (B, T, C_in)
    cols = [x_flat[:, k:k + T_out, :] for k in range(fw)]
    cols.append(jnp.ones((B, T_out, 1), jnp.bfloat16))             # bias column
    x_col = jnp.concatenate(cols, axis=-1)                         # (B, T_out, Kb) bf16
    x_col_p = jnp.pad(x_col, ((0, 0), (0, T_pad - T_out), (0, K_pad - Kb)))

    # ---- pallas call -------------------------------------------------------
    grid = (B, T_pad // tt)

    def _const_spec(shape):
        # DMA'd once (constant index); single-buffer to save VMEM headroom.
        return pl.BlockSpec(shape, lambda b, t: (0, 0), pipeline_mode=pl.Buffered(1))

    out = pl.pallas_call(
        temporal_block_kernel,
        out_shape=jax.ShapeDtypeStruct((B, T_pad, O_pad), jnp.float32),
        grid_spec=pltpu.PrefetchScalarGridSpec(
            num_scalar_prefetch=0,
            grid=grid,
            in_specs=[
                pl.BlockSpec((1, tt, K_pad), lambda b, t: (b, t, 0)),
                _const_spec((K_pad, C_pad)),
                _const_spec((C_pad, O_pad)),
                _const_spec((1, O_pad)),
            ],
            out_specs=pl.BlockSpec((1, tt, O_pad), lambda b, t: (b, t, 0)),
        ),
        compiler_params=pltpu.CompilerParams(
            dimension_semantics=("parallel", "parallel")),
    )(x_col_p, wexp_p, wshr_p, bshr_p)

    num_joints_out = out_dim // 3
    # Slice off the time/lane padding, then reshape to (B, T_out, J_out, 3).
    # (If a downstream consumer accepts the padded layout, return `out` directly.)
    return out[:, :T_out, :out_dim].reshape(B, T_out, num_joints_out, 3)


def reference_forward(x, params):
    """Pure-JAX f32 reference with PyTorch-layout weights (independent of the kernel path)."""
    B, T, J_in, F = x.shape
    eps = 1e-5
    xf = x.reshape(B, T, J_in * F).astype(jnp.float32)             # (B, T, C_in)
    w_exp, b_exp = params["w_exp"], params["b_exp"]
    channels, C_in, fw = w_exp.shape
    T_out = T - fw + 1
    # conv1d (valid): out[b, t, co] = sum_{ci,k} w[co, ci, k] * x[b, t + k, ci]
    windows = jnp.stack([xf[:, k:k + T_out, :] for k in range(fw)], axis=-1)  # (B,T_out,C_in,fw)
    conv = jnp.einsum("btck,ock->bto", windows, w_exp) + b_exp
    scale = params["gamma"] / jnp.sqrt(params["r_var"] + eps)
    y = (conv - params["r_mean"]) * scale + params["beta"]
    y = jnp.maximum(y, 0.0)
    out = jnp.einsum("btc,oc->bto", y, params["w_shr"][:, :, 0]) + params["b_shr"]
    return out.reshape(B, T_out, -1, 3)


if __name__ == "__main__":
    # small shapes consistent with the module
    B, T = 2, 16
    num_joints_in, in_features = 4, 2           # -> C_in = 8
    num_joints_out = 4                          # -> out_dim = 12
    filter_widths = [3]                         # odd, as asserted by the module
    channels = 32

    C_in = num_joints_in * in_features
    fw = filter_widths[0]
    out_dim = num_joints_out * 3

    key = jax.random.PRNGKey(0)
    keys = jax.random.split(key, 8)
    x = jax.random.normal(keys[0], (B, T, num_joints_in, in_features), jnp.float32)

    params = {
        "w_exp": 0.1 * jax.random.normal(keys[1], (channels, C_in, fw), jnp.float32),
        "b_exp": 0.05 * jax.random.normal(keys[2], (channels,), jnp.float32),
        "gamma": 1.0 + 0.1 * jax.random.normal(keys[3], (channels,), jnp.float32),
        "beta": 0.1 * jax.random.normal(keys[4], (channels,), jnp.float32),
        "r_mean": 0.1 * jax.random.normal(keys[5], (channels,), jnp.float32),
        "r_var": jnp.abs(1.0 + 0.1 * jax.random.normal(keys[6], (channels,), jnp.float32)),
        "w_shr": 0.1 * jax.random.normal(keys[7], (out_dim, channels, 1), jnp.float32),
        "b_shr": jnp.linspace(-0.1, 0.1, out_dim, dtype=jnp.float32),
    }

    # tt=8 -> grid (B, 2): exercises the time-tiled pipeline even at toy shapes.
    out = temporal_model_forward(x, params, tt=8)
    out = jax.block_until_ready(out)

    ref = reference_forward(x, params)
    assert out.shape == (B, T - fw + 1, num_joints_out, 3), out.shape
    # bf16 MXU inputs (f32 accumulation) vs. a pure-f32 reference -> ~1e-3 level error.
    assert jnp.allclose(out, ref, atol=2e-2, rtol=2e-2), "mismatch vs reference"

    print("KERNEL_OK")
</pallas_src>

<mosaic_0001>
module attributes {stable_mosaic.version = 11 : i64} {
  func.func @temporal_block_kernel(%arg0: i32, %arg1: i32, %arg2: memref<1x8x128xbf16, #tpu.memory_space<vmem>>, %arg3: memref<128x128xbf16, #tpu.memory_space<vmem>>, %arg4: memref<128x128xbf16, #tpu.memory_space<vmem>>, %arg5: memref<1x128xf32, #tpu.memory_space<vmem>>, %arg6: memref<1x8x128xf32, #tpu.memory_space<vmem>>) attributes {dimension_semantics = [#tpu.dimension_semantics<parallel>, #tpu.dimension_semantics<parallel>], iteration_bounds = array<i64: 2, 2>, scalar_prefetch = 0 : i64, scratch_operands = 0 : i64, tpu.core_type = #tpu.core_type<tc>, window_params = [{transform_indices = @transform_0, window_bounds = array<i64: 1, 8, 128>}, {pipeline_mode = #tpu.pipeline_mode<synchronous>, transform_indices = @transform_1, window_bounds = array<i64: 128, 128>}, {pipeline_mode = #tpu.pipeline_mode<synchronous>, transform_indices = @transform_2, window_bounds = array<i64: 128, 128>}, {pipeline_mode = #tpu.pipeline_mode<synchronous>, transform_indices = @transform_3, window_bounds = array<i64: 1, 128>}, {transform_indices = @transform_4, window_bounds = array<i64: 1, 8, 128>}]} {
    %c0 = arith.constant 0 : index
    %c0_0 = arith.constant 0 : index
    %c0_1 = arith.constant 0 : index
    %0 = vector.load %arg2[%c0, %c0_0, %c0_1] : memref<1x8x128xbf16, #tpu.memory_space<vmem>>, vector<1x8x128xbf16>
    %1 = vector.shape_cast %0 : vector<1x8x128xbf16> to vector<8x128xbf16>
    %c0_2 = arith.constant 0 : index
    %c0_3 = arith.constant 0 : index
    %2 = vector.load %arg3[%c0_2, %c0_3] : memref<128x128xbf16, #tpu.memory_space<vmem>>, vector<128x128xbf16>
    %cst = arith.constant dense<0.000000e+00> : vector<8x128xf32>
    %3 = tpu.matmul %1, %2, %cst {dimension_numbers = #tpu.dot_dimension_numbers<[1], [0], [0], [1], [0, 0, 1, 1], [], []>} : vector<8x128xbf16>, vector<128x128xbf16>, vector<8x128xf32> -> vector<8x128xf32>
    %4 = arith.truncf %3 : vector<8x128xf32> to vector<8x128xbf16>
    %cst_4 = arith.constant 0.000000e+00 : bf16
    %5 = vector.broadcast %cst_4 : bf16 to vector<8x128xbf16>
    %6 = arith.maximumf %4, %5 : vector<8x128xbf16>
    %c0_5 = arith.constant 0 : index
    %c0_6 = arith.constant 0 : index
    %7 = vector.load %arg4[%c0_5, %c0_6] : memref<128x128xbf16, #tpu.memory_space<vmem>>, vector<128x128xbf16>
    %cst_7 = arith.constant dense<0.000000e+00> : vector<8x128xf32>
    %8 = tpu.matmul %6, %7, %cst_7 {dimension_numbers = #tpu.dot_dimension_numbers<[1], [0], [0], [1], [0, 0, 1, 1], [], []>} : vector<8x128xbf16>, vector<128x128xbf16>, vector<8x128xf32> -> vector<8x128xf32>
    %c0_8 = arith.constant 0 : index
    %c0_9 = arith.constant 0 : index
    %9 = vector.load %arg5[%c0_8, %c0_9] : memref<1x128xf32, #tpu.memory_space<vmem>>, vector<1x128xf32>
    %10 = vector.broadcast %9 : vector<1x128xf32> to vector<8x128xf32>
    %11 = arith.addf %8, %10 : vector<8x128xf32>
    %c0_10 = arith.constant 0 : index
    %c0_11 = arith.constant 0 : index
    %c0_12 = arith.constant 0 : index
    %12 = vector.load %arg6[%c0_10, %c0_11, %c0_12] : memref<1x8x128xf32, #tpu.memory_space<vmem>>, vector<1x8x128xf32>
    %13 = vector.shape_cast %12 : vector<1x8x128xf32> to vector<8x128xf32>
    %14 = vector.shape_cast %11 : vector<8x128xf32> to vector<1x8x128xf32>
    tpu.vector_store %arg6[%c0_10, %c0_11, %c0_12], %14 {strides = array<i32>} : memref<1x8x128xf32, #tpu.memory_space<vmem>>, vector<1x8x128xf32>,
    return
  }
  func.func @transform_0(%arg0: i32, %arg1: i32) -> (i32, i32, i32) {
    %c0_i32 = arith.constant 0 : i32
    %c0_i32_0 = arith.constant 0 : i32
    return %arg0, %arg1, %c0_i32 : i32, i32, i32
  }
  func.func @transform_1(%arg0: i32, %arg1: i32) -> (i32, i32) {
    %c0_i32 = arith.constant 0 : i32
    %c0_i32_0 = arith.constant 0 : i32
    %c0_i32_1 = arith.constant 0 : i32
    return %c0_i32, %c0_i32_0 : i32, i32
  }
  func.func @transform_2(%arg0: i32, %arg1: i32) -> (i32, i32) {
    %c0_i32 = arith.constant 0 : i32
    %c0_i32_0 = arith.constant 0 : i32
    %c0_i32_1 = arith.constant 0 : i32
    return %c0_i32, %c0_i32_0 : i32, i32
  }
  func.func @transform_3(%arg0: i32, %arg1: i32) -> (i32, i32) {
    %c0_i32 = arith.constant 0 : i32
    %c0_i32_0 = arith.constant 0 : i32
    %c0_i32_1 = arith.constant 0 : i32
    return %c0_i32, %c0_i32_0 : i32, i32
  }
  func.func @transform_4(%arg0: i32, %arg1: i32) -> (i32, i32, i32) {
    %c0_i32 = arith.constant 0 : i32
    %c0_i32_0 = arith.constant 0 : i32
    return %arg0, %arg1, %c0_i32 : i32, i32, i32
  }
}

</mosaic_0001>

<bundles_post_ra>
// kernel: tpu_custom_call.1
= control target key start
LH: loop header
LB: loop body
LE: loop exit
PB: predicated region body
PF: predicated region fallthrough
CT: control target
= control target key end

     0   :  { %s1157_s0 = inlined_call_operand.hbm [shape: bf16[2,16,128], index: 0, kind: input, shape index: {}]   ;;  %s1158_s1 = inlined_call_operand.hbm [shape: bf16[128,128], index: 1, kind: input, shape index: {}]   ;;  %s1159_s2 = inlined_call_operand.hbm [shape: bf16[128,128], index: 2, kind: input, shape index: {}]   ;;  %s1160_s3 = inlined_call_operand.vmem [shape: f32[1,128], index: 3, kind: input, shape index: {}]   ;;  %s1161_s4 = inlined_call_operand.hbm [shape: f32[2,16,128], index: 4, kind: output, shape index: {}]  }
   0x1   :  { %1165 = sst [smem:[#allocation15_spill]] %s1158_s1 }
   0x2   :  { %1166 = sst [smem:[#allocation16_spill]] %s1159_s2 }
   0x3   :  { %9 = vsyncpa [#allocation3], 0 }
   0x4   :  { %11 = vsyncpa [#allocation3 + $0x1], 0 }
   0x5   :  { %12 = vsyncpa [#allocation6], 0 }
   0x6   :  { %13 = vsyncpa [#allocation4], 0 }
   0x7   :  { %15 = vsyncpa [#allocation4 + $0x1], 0  ;;  %s976_s15 = smov 0   ;;  %s978_s16 = smov 0  }
   0x8   :  { %s980_s17 = smov 0   ;;  %s982_s18 = smov 0  }
   0x9   :  { %s984_s19 = smov 0   ;;  %s986_s20 = smov 0  }
   0xa   :  { %s988_s21 = smov 0   ;;  %s990_s22 = smov 0  }
   0xb LB: > { %1167 = sst [smem:[#allocation12_spill]] %s917_s15  ;;  %s552_s23 = sadd.s32 4294967295, %s945_s22   ;;  %s945_s22 = sphi %s990_s22, %s21_s22   ;;  %s941_s21 = sphi %s988_s21, %s1187_s21   ;;  %s937_s20 = sphi %s986_s20, %s1186_s20   ;;  %s933_s19 = sphi %s984_s19, %s1185_s19   ;;  %s929_s18 = sphi %s982_s18, %s1184_s18   ;;  %s925_s17 = sphi %s980_s17, %s1183_s17   ;;  %s921_s16 = sphi %s978_s16, %s1182_s16   ;;  %s917_s15 = sphi %s976_s15, %s1181_s15  }
   0xc   : > { %p554_p0 = scmp.ge.s32.totalorder %s945_s22, 1  ;;  %p1020_p1 = scmp.eq.s32.totalorder %s552_s23, 0 }
   0xd   : > { %p157_p2 = scmp.lt.s32.totalorder %s945_s22, 5  ;;  %s1169_s1 = sld [smem:[#allocation15_spill]] }
   0xe   : > { %s947_s29 = smov [#allocation5]   ;;  %s1171_s2 = sld [smem:[#allocation16_spill]] }
   0xf   : > { %p1028_p3 = pnand %p554_p0, %p157_p2  ;;  %s170_s30 = sshll.u32 %s947_s29, 4  ;;  %s171_s30 = int_to_ptr.vmem [resolvable:$true] %s170_s30 }
  0x10   : > { %s948_s8 = smov 64   ;;  %s949_s9 = smov 4  }
  0x11   : > { %p663_p4 = pneg %p1028_p3  ;;  %s950_s10 = smov [#allocation7]  }
  0x12   : > { %s184_s11 = sshll.u32 %s950_s10, 4  ;;  %s553_s12 = sadd.s32 4294967294, %s945_s22   ;;  %s185_s11 = int_to_ptr.vmem [resolvable:$true] %s184_s11 }
  0x13   : > { %s168_s27 = sshll.u32 %s1169_s1, 4  ;;  %p664_p5 = pnand %p663_p4, %p1020_p1  ;;  %s169_s27 = int_to_ptr.hbm [resolvable:$true] %s168_s27 }
  0x14   : > { %s182_s7 = sshll.u32 %s1171_s2, 4  ;;  %s30_s13 = sadd.s32 1, %s937_s20  ;;  %s183_s7 = int_to_ptr.hbm [resolvable:$true] %s182_s7 }
  0x15   : > { %666 = dma.hbm_to_vmem [thread:$0]  (!%p664_p5), %s169_s27, 1024, %s171_s30, [#allocation6], %s948_s8, %s948_s8, %s949_s9  }
  0x16   : > { %669 = dma.hbm_to_vmem [thread:$0]  (!%p664_p5), %s183_s7, 1024, %s185_s11, [#allocation6], %s948_s8, %s948_s8, %s949_s9  }
  0x17   : > { %p31_p6 = scmp.ge.s32.totalorder %s30_s13, 2  ;;  %s33_s14 = sadd.s32 1, %s941_s21 }
  0x18   : > { %s42_s25 = sadd.s32 1, %s925_s17  ;;  %p49_p7 = scmp.ne.s32.totalorder %s925_s17, %s921_s16 }
  0x19   : > { %s1189_s13 = smov (%p31_p6, %s30_s13), 0  ;;  %s1191_s14 = smov (!%p31_p6, %s33_s14), %s941_s21 }
  0x1a   : > { %1172 = sst [smem:[#allocation13_spill]] %s1189_s13  ;;  %s38_s26 = ssub.s32 %s937_s20, %s1189_s13 }
  0x1b   : > { %p50_p8 = scmp.eq.s32.totalorder %s945_s22, 0  ;;  %p35_p9 = scmp.ge.s32.totalorder %s1191_s14, 2 }
  0x1c   : > { %p55_p10 = scmp.ne.s32.totalorder %s921_s16, %s917_s15  ;;  %p144_p12 = scmp.eq.s32.totalorder %s552_s23, 3 }
  0x1d   : > { %p1053_p11 = por %p50_p8, %p49_p7  ;;  %s1193_s14 = smov (%p35_p9, %s1191_s14), 0 }
  0x1e   : > { %1174 = sst [smem:[#allocation14_spill]] %s1193_s14  ;;  %p1063_p13 = por %p1020_p1, %p55_p10 }
  0x1f   : > { %p1067_p0 = por %p144_p12, %p49_p7  ;;  %s37_s5 = ssub.s32 %s941_s21, %s1193_s14 }
  0x20   : > { %p150_p2 = scmp.eq.s32.totalorder %s553_s12, 3  ;;  %s39_s6 = sor.u32 %s38_s26, %s37_s5 }
  0x21   : > { %p680_p4 = scmp.lt.s32.totalorder %s945_s22, 4  ;;  %p40_p5 = scmp.eq.s32.totalorder %s39_s6, 0 }
  0x22   : > { %p1074_p6 = por %p150_p2, %p55_p10  ;;  %s201_s7 = sand.u32 1, %s925_s17  }
  0x23   : > { %s559_s8 = sshll.u32 %s941_s21, 1  ;;  %s558_s10 = sshll.u32 %s201_s7, 2 }
  0x24   : > { %s1081_s9 = scalar_select %p40_p5, %s925_s17, %s42_s25  }
  0x25   : > { %s209_s11 = sadd.s32 %s937_s20, %s559_s8  ;;  %s205_s2 = scalar_lea.vmem [#allocation2], %s558_s10 }
  0x26   : > { %s560_s1 = sshll.u32 %s209_s11, 2  ;;  %s215_s13 = sshll.u32 %s205_s2, 4  ;;  %s216_s13 = int_to_ptr.vmem [resolvable:$true] %s215_s13 }
  0x27   : > { %s211_s15 = scalar_lea.hbm %s1157_s0, %s560_s1  ;;  %p671_p7 = pnand %p680_p4, %p1053_p11 }
  0x28   : > { %s213_s26 = sshll.u32 %s211_s15, 4  ;;  %s202_s5 = scalar_lea.sflag [#allocation3], %s201_s7  ;;  %s214_s26 = int_to_ptr.hbm [resolvable:$true] %s213_s26 }
  0x29   : > { %673 = dma.hbm_to_vmem [thread:$0]  (!%p671_p7), %s214_s26, 64, %s216_s13, %s202_s5  }
  0x2a   : > { %224 = sbr.rel (%p1028_p3) target bundleno = 346 (0x15a), region = 36  ;;  %s1094_s25 = sand.u32 (!%p1028_p3), 1, %s921_s16  }
  0x2b   : > { %s562_s2 = sshll.u32 (!%p1028_p3), %s1094_s25, 2  ;;  %s227_s14 = scalar_lea.sflag (!%p1028_p3), [#allocation3], %s1094_s25 }
  0x2c   : > { %s1098_s1 = scalar_lea.vmem (!%p1028_p3), [#allocation2], %s562_s2 }
  0x2f   : > { %904 = dma.done.wait (%p1063_p13), %s227_s14, 64  }
  0x30   : > { %906 = vsyncadd (%p1063_p13), %s227_s14, 4294967232 }
  0x31   : > { %908 = dma.done.wait (%p1020_p1), [#allocation6], 2048  }
  0x32   : > { %910 = vsyncadd (%p1020_p1), [#allocation6], 4294965248  ;;  %v642_v0 = vld [vmem:[#allocation5 + $0x38] sm:$0xff]  ;;  %v641_v1 = vld [vmem:[#allocation5 + $0x30] sm:$0xff]  ;;  %s631_s15 = sshll.u32 %s933_s19, 1  ;;  %s565_s13 = sshll.u32 %s1094_s25, 3 }
  0x33   : > { %331 = vmatpush.bf16.msra.mxu0 %v642_v0  ;;  %v650_v2 = vld [vmem:[#allocation7 + $0x38] sm:$0xff]  ;;  %v649_v3 = vld [vmem:[#allocation7 + $0x30] sm:$0xff]  ;;  %v640_v4 = vld [vmem:[#allocation5 + $0x28] sm:$0xff]  ;;  %s441_s24 = sadd.s32 %s929_s18, %s631_s15  ;;  %s265_s10 = scalar_lea.vmem [#allocation8], %s565_s13 }
  0x34   : > { %416 = vmatpush.bf16.msra.mxu1 %v650_v2  ;;  %v648_v5 = vld [vmem:[#allocation7 + $0x28] sm:$0xff]  ;;  %v639_v6 = vld [vmem:[#allocation5 + $0x20] sm:$0xff]  ;;  %v638_v8 = vld [vmem:[#allocation5 + $0x18] sm:$0xff]  ;;  %s632_s28 = sshll.u32 %s441_s24, 3  ;;  %s445_s11 = sshll.u32 %s265_s10, 4  ;;  %s446_s11 = int_to_ptr.vmem [resolvable:$true] %s445_s11 }
  0x35   : > { %v647_v7 = vld [vmem:[#allocation7 + $0x20] sm:$0xff]  ;;  %v646_v9 = vld [vmem:[#allocation7 + $0x18] sm:$0xff]  ;;  %v637_v10 = vld [vmem:[#allocation5 + $0x10] sm:$0xff]  ;;  %s443_s6 = scalar_lea.hbm %s1161_s4, %s632_s28  ;;  %s431_s18 = scalar_lea.sflag [#allocation4], %s1094_s25 }
  0x36   : > { %v645_v11 = vld [vmem:[#allocation7 + $0x10] sm:$0xff]  ;;  %v636_v12 = vld [vmem:[#allocation5 + $0x8] sm:$0xff]  ;;  %v635_v14 = vld [vmem:[#allocation5] sm:$0xff]  ;;  %s447_s12 = sshll.u32 %s443_s6, 4  ;;  %s863_s14 = scalar_lea.hbm %s1161_s4, 32  ;;  %s448_s12 = int_to_ptr.hbm [resolvable:$true] %s447_s12 }
  0x37   : > { %332 = vmatpush.bf16.msra.mxu0 %v641_v1  ;;  %v644_v13 = vld [vmem:[#allocation7 + $0x8] sm:$0xff]  ;;  %v266_v15 = vld [vmem:[%s1098_s1] sm:$0xf]  ;;  %v643_v16 = vld [vmem:[#allocation7] sm:$0xff]  ;;  %s857_s19 = sshra.s32 %s448_s12, 4  ;;  %s858_s19 = int_to_ptr.hbm [resolvable:$true] %s857_s19 }
  0x38   : > { %417 = vmatpush.bf16.msra.mxu1 %v649_v3  ;;  %v752_v21 = vld [vmem:[%s1160_s3] ss:$0 sm:$0xff]  ;;  %s859_s26 = scalar_lea.hbm %s858_s19, 8  ;;  %p864_p9 = scmp.lt.s32.totalorder %s858_s19, %s1161_s4 }
  0x39   : > { %p860_p1 = scmp.ne.s32.totalorder %s858_s19, %s859_s26  ;;  %p865_p10 = scmp.lt.s32.totalorder %s863_s14, %s859_s26 }
  0x3b   : > { %333 = vmatpush.bf16.msra.mxu0 %v640_v4  ;;  %p861_p3 = pnand %p860_p1, %p1067_p0  ;;  %p866_p11 = por %p865_p10, %p864_p9 }
  0x3c   : > { %418 = vmatpush.bf16.msra.mxu1 %v648_v5 }
  0x3d   : > { %p862_p8 = pneg %p861_p3 }
  0x3f   : > { %334 = vmatpush.bf16.msra.mxu0 %v639_v6  ;;  %p867_p12 = pnand %p866_p11, %p862_p8 }
  0x40   : > { %419 = vmatpush.bf16.msra.mxu1 %v647_v7 }
  0x43   : > { %335 = vmatpush.bf16.msra.mxu0 %v638_v8 }
  0x44   : > { %420 = vmatpush.bf16.msra.mxu1 %v646_v9 }
  0x47   : > { %336 = vmatpush.bf16.msra.mxu0 %v637_v10 }
  0x48   : > { %421 = vmatpush.bf16.msra.mxu1 %v645_v11 }
  0x4b   : > { %337 = vmatpush.bf16.msra.mxu0 %v636_v12 }
  0x4c   : > { %422 = vmatpush.bf16.msra.mxu1 %v644_v13 }
  0x4f   : > { %338 = vmatpush.bf16.msra.mxu0 %v635_v14 }
  0x50   : > { %423 = vmatpush.bf16.msra.mxu1 %v643_v16 }
  0x52   : > { %339 = vmatmul.bf16.vlgmr.msra.gmra.mxu0 %v266_v15 }
  0xcf   : > { %v340_v17 = vpop.f32.mrf.mxu0 }
  0xd0   : > { %v346_v18 = vmax.f32 %v340_v17, 0.0 }
  0xd2   : > { %v347_v19 = vpack.c.bf16 %v346_v18, %v346_v18 }
  0xd4   : > { %424 = vmatmul.bf16.vlgmr.msra.gmra.mxu1 %v347_v19 }
  0xd7   : > { %v342_v20 = vpop.f32.mrf.mxu0 }
 0x151   : > { %v425_v22 = vpop.f32.mrf.mxu1 }
 0x152   : > { %v426_v23 = vadd.f32 %v752_v21, %v425_v22 }
 0x154   : > { %429 = vst [vmem:[%s265_s10] sm:$0xff] %v426_v23 }
 0x155   : > { %870 = shalt.err (!%p867_p12)
}
 0x156   : > { %661 = dma.vmem_to_hbm [thread:$0]  (%p1067_p0), %s446_s11, 128, %s448_s12, %s431_s18  }
 0x159   : > { %v427_v24 = vpop.f32.mrf.mxu1 }
 0x15a PF: > { %s1178_s25 = sld [smem:[#allocation12_spill]]  ;;  %p683_p13 = scmp.ge.s32.totalorder %s945_s22, 2 }
 0x15c   : > { %p675_p2 = pnand %p683_p13, %p1074_p6 }
 0x15e   : > { %p676_p4 = pneg %p675_p2 }
 0x160   : > { %s459_s24 = sand.u32 1, %s1178_s25  }
 0x161   : > { %s460_s28 = scalar_lea.sflag [#allocation4], %s459_s24 }
 0x162   : > { %912 = dma.done.wait (%p676_p4), %s460_s28, 128  }
 0x163   : > { %914 = vsyncadd (%p676_p4), %s460_s28, 4294967168  ;;  %s21_s22 = sadd.s32 1, %s945_s22   ;;  %s1179_s30 = sld [smem:[#allocation13_spill]] }
 0x164   : > { %p18_p5 = scmp.ge.s32.totalorder %s21_s22, 6   ;;  %s1180_s13 = sld [smem:[#allocation14_spill]] }
 0x165   : > { %s1181_s15 = smov %s921_s16  ;;  %s1182_s16 = smov %s925_s17 }
 0x166   : > { %s1183_s17 = smov %s1081_s9  ;;  %s1184_s18 = smov %s937_s20 }
 0x167   : > { %s1185_s19 = smov %s941_s21  ;;  %20 = sbr.rel (!%p18_p5) target bundleno = 11 (0xb), region = 89 }
 0x169   : > { %s1186_s20 = smov %s1179_s30 }
 0x16a   : > { %s1187_s21 = smov %s1180_s13 }
 0x16c   :  { %466 = vsyncpa [#allocation3], 1 }
 0x16d   :  { %468 = vsyncpa [#allocation3 + $0x1], 1 }
 0x16e   :  { %469 = vsyncpa [#allocation6], 1 }
 0x16f   :  { %470 = vsyncpa [#allocation4], 1 }
 0x170   :  { %472 = vsyncpa [#allocation4 + $0x1], 1 }

</bundles_post_ra>
